<compile_context>
chip_gen: v7x
topology: tpu7x:2x2x1
jax: 0.10.0
libtpu: 0.0.40
codegen_flags: <defaults>
</compile_context>

<pallas_src>
import functools

import jax
import jax.numpy as jnp
import numpy as np
from jax.experimental import pallas as pl
from jax.experimental.pallas import tpu as pltpu


# ----------------------------------------------------------------------------
# Kernel: grid=(num_batch_tiles,).  One grid step processes one batch tile:
# it encodes every agent (static unrolled loop), sums the relu activations in
# a loop-carried value and runs the q-MLP, all in f32.
# ----------------------------------------------------------------------------
def qtran_qbase_kernel(
    hid_ref,    # (tB, N, H)  f32
    act_ref,    # (tB, N, A)  f32
    st_ref,     # (tB, S)     f32
    w1h_ref,    # (H, ae)     hidden part of encoder layer 1
    w1a_ref,    # (A, ae)     action part of encoder layer 1
    b1_ref,     # (1, ae)
    wq1s_ref,   # (S, qh)     state part of q layer 1
    wenc_ref,   # (ae, qh)    = w2 @ wq1_enc  (encoder layer 2 folded in)
    bq1f_ref,   # (1, qh)     = n_agents*(b2 @ wq1_enc) + bq1
    wq2_ref,    # (qh, qh)
    bq2_ref,    # (1, qh)
    wq3r_ref,   # (1, qh)     = wq3.T (final layer done on the VPU)
    bq3_ref,    # (1, 1)
    out_ref,    # (tB, 1)     f32
):
    n_agents = hid_ref.shape[1]

    w1h = w1h_ref[...]
    w1a = w1a_ref[...]
    b1 = b1_ref[...]

    # Encoder layer 1 + ReLU per agent; cat(hidden, action) fused via the w1
    # split.  Static unroll (N is tiny); hsum is a loop-carried value, not a
    # VMEM scratch, and encoder layer 2 is linear -> already folded into wenc.
    hsum = None
    for n in range(n_agents):
        h = jnp.dot(hid_ref[:, n, :], w1h, preferred_element_type=jnp.float32)
        h = h + jnp.dot(act_ref[:, n, :], w1a,
                        preferred_element_type=jnp.float32)
        h = jnp.maximum(h + b1, 0.0)
        hsum = h if hsum is None else hsum + h

    # q layer 1: cat([state, enc_sum]) fused via the wq1 split + w2 folding.
    h1 = jnp.dot(st_ref[...], wq1s_ref[...],
                 preferred_element_type=jnp.float32)
    h1 = h1 + jnp.dot(hsum, wenc_ref[...],
                      preferred_element_type=jnp.float32)
    h1 = jnp.maximum(h1 + bq1f_ref[...], 0.0)

    # q layer 2
    h2 = jnp.dot(h1, wq2_ref[...], preferred_element_type=jnp.float32)
    h2 = jnp.maximum(h2 + bq2_ref[...], 0.0)

    # q layer 3 (qh -> 1): VPU multiply + lane reduction (no 1-column matmul).
    q = jnp.sum(h2 * wq3r_ref[...], axis=-1, keepdims=True) + bq3_ref[...]
    out_ref[...] = q.astype(out_ref.dtype)


# ----------------------------------------------------------------------------
# One-time parameter preparation (outside the hot path): weight splits and the
# algebraic fusion of the second encoder Linear.  Everything stays f32.
# ----------------------------------------------------------------------------
def prepare_params(params, *, rnn_hidden_dim, state_shape, n_agents):
    w1, b1 = params["w1"], params["b1"]
    w2, b2 = params["w2"], params["b2"]
    wq1, bq1 = params["wq1"], params["bq1"]

    wq1_s = wq1[:state_shape, :]
    wq1_e = wq1[state_shape:, :]

    # enc_sum @ wq1_e == (h_sum @ w2 + n_agents*b2) @ wq1_e
    #                 == h_sum @ (w2 @ wq1_e) + n_agents*(b2 @ wq1_e)
    # (exact for this module: the forward always sums over all n_agents rows)
    w_enc = jnp.dot(w2, wq1_e)                        # (ae, qh)
    bq1_fused = n_agents * jnp.dot(b2, wq1_e) + bq1   # (1, qh)

    return dict(
        w1h=w1[:rnn_hidden_dim, :],
        w1a=w1[rnn_hidden_dim:, :],
        b1=b1,
        wq1s=wq1_s,
        wenc=w_enc,
        bq1f=bq1_fused,
        wq2=params["wq2"],
        bq2=params["bq2"],
        wq3r=params["wq3"].T,      # (1, qh)
        bq3=params["bq3"],
    )


# ----------------------------------------------------------------------------
# Forward wrapper: free reshapes, optional batch padding to a whole number of
# tiles, and the pallas_call.  No concat, no transpose, no per-call slicing.
# ----------------------------------------------------------------------------
@functools.partial(jax.jit, static_argnames=("batch_tile",))
def qtran_qbase_forward(state, hidden_states, actions, prepared, *,
                        batch_tile=512):
    E, T, N, A = actions.shape
    H = hidden_states.shape[-1]
    S = state.shape[-1]
    B = E * T

    hid = hidden_states.reshape(B, N, H)   # free reshapes (row-major)
    act = actions.reshape(B, N, A)
    st = state.reshape(B, S)

    # Batch tile: ~512 rows keeps the whole pipeline (double-buffered blocks,
    # resident weights, intermediates) around 10 MiB of VMEM -> safe under
    # v5e's 16 MiB scoped default and well under v7x's 64 MiB physical VMEM,
    # while being large enough to amortise the ~0.35 us per-grid-step cost.
    tB = min(batch_tile, B)
    if tB < B:
        tB = max(8, (tB // 8) * 8)          # sublane alignment for tiled dims
    n_tiles = -(-B // tB)
    Bp = n_tiles * tB
    if Bp != B:                             # pad the last partial tile
        pad = Bp - B
        hid = jnp.pad(hid, ((0, pad), (0, 0), (0, 0)))
        act = jnp.pad(act, ((0, pad), (0, 0), (0, 0)))
        st = jnp.pad(st, ((0, pad), (0, 0)))

    p = prepared
    weights = (p["w1h"], p["w1a"], p["b1"], p["wq1s"], p["wenc"], p["bq1f"],
               p["wq2"], p["bq2"], p["wq3r"], p["bq3"])

    def weight_spec(a):
        # Constant index_map -> fetched once, VMEM-resident across all tiles.
        return pl.BlockSpec(a.shape, lambda i: (0, 0))

    in_specs = [
        pl.BlockSpec((tB, N, H), lambda i: (i, 0, 0)),
        pl.BlockSpec((tB, N, A), lambda i: (i, 0, 0)),
        pl.BlockSpec((tB, S), lambda i: (i, 0)),
    ] + [weight_spec(a) for a in weights]

    out = pl.pallas_call(
        qtran_qbase_kernel,
        out_shape=jax.ShapeDtypeStruct((Bp, 1), jnp.float32),
        grid=(n_tiles,),
        in_specs=in_specs,
        out_specs=pl.BlockSpec((tB, 1), lambda i: (i, 0)),
        compiler_params=pltpu.CompilerParams(
            dimension_semantics=("parallel",),       # shards tiles across TCs
            vmem_limit_bytes=32 * 1024 * 1024),
    )(hid, act, st, *weights)

    return out[:B] if Bp != B else out


# ----------------------------------------------------------------------------
# Deterministic parameter init (PyTorch-Linear-style uniform bounds).
# Weights stored as (in_features, out_features).
# ----------------------------------------------------------------------------
def init_params(key, rnn_hidden_dim, n_actions, state_shape, qtran_hidden_dim):
    ae = rnn_hidden_dim + n_actions
    q_in = state_shape + n_actions + rnn_hidden_dim
    qh = qtran_hidden_dim

    def linear(k, fan_in, fan_out):
        bound = 1.0 / np.sqrt(fan_in)
        kw, kb = jax.random.split(k)
        w = jax.random.uniform(kw, (fan_in, fan_out), jnp.float32, -bound, bound)
        b = jax.random.uniform(kb, (1, fan_out), jnp.float32, -bound, bound)
        return w, b

    k = jax.random.split(key, 5)
    w1, b1 = linear(k[0], ae, ae)
    w2, b2 = linear(k[1], ae, ae)
    wq1, bq1 = linear(k[2], q_in, qh)
    wq2, bq2 = linear(k[3], qh, qh)
    wq3, bq3 = linear(k[4], qh, 1)
    return dict(w1=w1, b1=b1, w2=w2, b2=b2,
                wq1=wq1, bq1=bq1, wq2=wq2, bq2=bq2, wq3=wq3, bq3=bq3)


# ----------------------------------------------------------------------------
# Pure-JAX f32 reference (mirrors the PyTorch forward exactly) for validation.
# ----------------------------------------------------------------------------
def reference(state, hidden_states, actions, params):
    E, T, N, A = actions.shape
    H = hidden_states.shape[-1]
    B = E * T
    ha = jnp.concatenate([hidden_states, actions], axis=-1).reshape(-1, H + A)
    h = jnp.maximum(ha @ params["w1"] + params["b1"], 0.0)
    enc = h @ params["w2"] + params["b2"]
    enc_sum = enc.reshape(B, N, -1).sum(axis=-2)
    x = jnp.concatenate([state.reshape(B, -1), enc_sum], axis=-1)
    h1 = jnp.maximum(x @ params["wq1"] + params["bq1"], 0.0)
    h2 = jnp.maximum(h1 @ params["wq2"] + params["bq2"], 0.0)
    return h2 @ params["wq3"] + params["bq3"]


def _make_inputs(key, episode_num, max_episode_len, n_agents,
                 rnn_hidden_dim, n_actions, state_shape):
    k_state, k_hidden, k_act = jax.random.split(key, 3)
    state = jax.random.normal(
        k_state, (episode_num, max_episode_len, state_shape), jnp.float32)
    hidden_states = jax.random.normal(
        k_hidden, (episode_num, max_episode_len, n_agents, rnn_hidden_dim),
        jnp.float32)
    action_ids = jax.random.randint(
        k_act, (episode_num, max_episode_len, n_agents), 0, n_actions)
    actions = jax.nn.one_hot(action_ids, n_actions, dtype=jnp.float32)
    return state, hidden_states, actions


if __name__ == "__main__":
    # small QTRAN-like config
    n_agents = 3
    rnn_hidden_dim, n_actions, state_shape, qtran_hidden_dim = 32, 4, 24, 32

    key = jax.random.PRNGKey(0)
    k_in1, k_in2, k_params = jax.random.split(key, 3)

    params = init_params(k_params, rnn_hidden_dim, n_actions,
                         state_shape, qtran_hidden_dim)
    prepared = prepare_params(params,
                              rnn_hidden_dim=rnn_hidden_dim,
                              state_shape=state_shape,
                              n_agents=n_agents)

    # --- case 1: toy shapes, single batch tile ------------------------------
    state, hidden_states, actions = _make_inputs(
        k_in1, 2, 8, n_agents, rnn_hidden_dim, n_actions, state_shape)
    q_tot = qtran_qbase_forward(state, hidden_states, actions, prepared)
    q_tot = jax.block_until_ready(q_tot)
    assert q_tot.shape == (2 * 8, 1), q_tot.shape
    q_ref = reference(state, hidden_states, actions, params)
    np.testing.assert_allclose(np.asarray(q_tot), np.asarray(q_ref),
                               rtol=1e-3, atol=1e-3)

    # --- case 2: exercises batch tiling (multi-tile grid + tail padding) ----
    state2, hidden2, actions2 = _make_inputs(
        k_in2, 5, 16, n_agents, rnn_hidden_dim, n_actions, state_shape)
    q_tot2 = qtran_qbase_forward(state2, hidden2, actions2, prepared,
                                 batch_tile=32)   # 80 rows -> 3 tiles, padded
    q_tot2 = jax.block_until_ready(q_tot2)
    assert q_tot2.shape == (5 * 16, 1), q_tot2.shape
    q_ref2 = reference(state2, hidden2, actions2, params)
    np.testing.assert_allclose(np.asarray(q_tot2), np.asarray(q_ref2),
                               rtol=1e-3, atol=1e-3)

    print("KERNEL_OK")
</pallas_src>

<mosaic_0001>
module attributes {stable_mosaic.version = 11 : i64} {
  func.func @qtran_qbase_kernel(%arg0: i32, %arg1: memref<16x3x32xf32, #tpu.memory_space<vmem>>, %arg2: memref<16x3x4xf32, #tpu.memory_space<vmem>>, %arg3: memref<16x24xf32, #tpu.memory_space<vmem>>, %arg4: memref<32x36xf32, #tpu.memory_space<vmem>>, %arg5: memref<4x36xf32, #tpu.memory_space<vmem>>, %arg6: memref<1x36xf32, #tpu.memory_space<vmem>>, %arg7: memref<24x32xf32, #tpu.memory_space<vmem>>, %arg8: memref<36x32xf32, #tpu.memory_space<vmem>>, %arg9: memref<1x32xf32, #tpu.memory_space<vmem>>, %arg10: memref<32x32xf32, #tpu.memory_space<vmem>>, %arg11: memref<1x32xf32, #tpu.memory_space<vmem>>, %arg12: memref<1x32xf32, #tpu.memory_space<vmem>>, %arg13: memref<1x1xf32, #tpu.memory_space<vmem>>, %arg14: memref<16x1xf32, #tpu.memory_space<vmem>>) attributes {dimension_semantics = [#tpu.dimension_semantics<parallel>], iteration_bounds = array<i64: 1>, scalar_prefetch = 0 : i64, scratch_operands = 0 : i64, tpu.core_type = #tpu.core_type<tc>, window_params = [{transform_indices = @transform_0, window_bounds = array<i64: 16, 3, 32>}, {transform_indices = @transform_1, window_bounds = array<i64: 16, 3, 4>}, {transform_indices = @transform_2, window_bounds = array<i64: 16, 24>}, {pipeline_mode = #tpu.pipeline_mode<synchronous>, transform_indices = @transform_3, window_bounds = array<i64: 32, 36>}, {pipeline_mode = #tpu.pipeline_mode<synchronous>, transform_indices = @transform_4, window_bounds = array<i64: 4, 36>}, {pipeline_mode = #tpu.pipeline_mode<synchronous>, transform_indices = @transform_5, window_bounds = array<i64: 1, 36>}, {pipeline_mode = #tpu.pipeline_mode<synchronous>, transform_indices = @transform_6, window_bounds = array<i64: 24, 32>}, {pipeline_mode = #tpu.pipeline_mode<synchronous>, transform_indices = @transform_7, window_bounds = array<i64: 36, 32>}, {pipeline_mode = #tpu.pipeline_mode<synchronous>, transform_indices = @transform_8, window_bounds = array<i64: 1, 32>}, {pipeline_mode = #tpu.pipeline_mode<synchronous>, transform_indices = @transform_9, window_bounds = array<i64: 32, 32>}, {pipeline_mode = #tpu.pipeline_mode<synchronous>, transform_indices = @transform_10, window_bounds = array<i64: 1, 32>}, {pipeline_mode = #tpu.pipeline_mode<synchronous>, transform_indices = @transform_11, window_bounds = array<i64: 1, 32>}, {pipeline_mode = #tpu.pipeline_mode<synchronous>, transform_indices = @transform_12, window_bounds = array<i64: 1, 1>}, {transform_indices = @transform_13, window_bounds = array<i64: 16, 1>}]} {
    %c0 = arith.constant 0 : index
    %c0_0 = arith.constant 0 : index
    %0 = vector.load %arg4[%c0, %c0_0] : memref<32x36xf32, #tpu.memory_space<vmem>>, vector<32x36xf32>
    %c0_1 = arith.constant 0 : index
    %c0_2 = arith.constant 0 : index
    %1 = vector.load %arg5[%c0_1, %c0_2] : memref<4x36xf32, #tpu.memory_space<vmem>>, vector<4x36xf32>
    %c0_3 = arith.constant 0 : index
    %c0_4 = arith.constant 0 : index
    %2 = vector.load %arg6[%c0_3, %c0_4] : memref<1x36xf32, #tpu.memory_space<vmem>>, vector<1x36xf32>
    %c0_5 = arith.constant 0 : index
    %c0_6 = arith.constant 0 : index
    %c0_7 = arith.constant 0 : index
    %3 = vector.load %arg1[%c0_5, %c0_6, %c0_7] : memref<16x3x32xf32, #tpu.memory_space<vmem>>, vector<16x1x32xf32>
    %4 = vector.shape_cast %3 : vector<16x1x32xf32> to vector<16x32xf32>
    %cst = arith.constant dense<0.000000e+00> : vector<16x36xf32>
    %5 = tpu.matmul %4, %0, %cst {dimension_numbers = #tpu.dot_dimension_numbers<[1], [0], [0], [1], [0, 0, 1, 1], [], []>} : vector<16x32xf32>, vector<32x36xf32>, vector<16x36xf32> -> vector<16x36xf32>
    %c0_8 = arith.constant 0 : index
    %c0_9 = arith.constant 0 : index
    %c0_10 = arith.constant 0 : index
    %6 = vector.load %arg2[%c0_8, %c0_9, %c0_10] : memref<16x3x4xf32, #tpu.memory_space<vmem>>, vector<16x1x4xf32>
    %7 = vector.shape_cast %6 : vector<16x1x4xf32> to vector<16x4xf32>
    %cst_11 = arith.constant dense<0.000000e+00> : vector<16x36xf32>
    %8 = tpu.matmul %7, %1, %cst_11 {dimension_numbers = #tpu.dot_dimension_numbers<[1], [0], [0], [1], [0, 0, 1, 1], [], []>} : vector<16x4xf32>, vector<4x36xf32>, vector<16x36xf32> -> vector<16x36xf32>
    %9 = arith.addf %5, %8 : vector<16x36xf32>
    %10 = vector.broadcast %2 : vector<1x36xf32> to vector<16x36xf32>
    %11 = arith.addf %9, %10 : vector<16x36xf32>
    %cst_12 = arith.constant 0.000000e+00 : f32
    %12 = vector.broadcast %cst_12 : f32 to vector<16x36xf32>
    %13 = arith.maximumf %11, %12 : vector<16x36xf32>
    %c0_13 = arith.constant 0 : index
    %c1 = arith.constant 1 : index
    %c0_14 = arith.constant 0 : index
    %14 = vector.load %arg1[%c0_13, %c1, %c0_14] : memref<16x3x32xf32, #tpu.memory_space<vmem>>, vector<16x1x32xf32>
    %15 = vector.shape_cast %14 : vector<16x1x32xf32> to vector<16x32xf32>
    %cst_15 = arith.constant dense<0.000000e+00> : vector<16x36xf32>
    %16 = tpu.matmul %15, %0, %cst_15 {dimension_numbers = #tpu.dot_dimension_numbers<[1], [0], [0], [1], [0, 0, 1, 1], [], []>} : vector<16x32xf32>, vector<32x36xf32>, vector<16x36xf32> -> vector<16x36xf32>
    %c0_16 = arith.constant 0 : index
    %c1_17 = arith.constant 1 : index
    %c0_18 = arith.constant 0 : index
    %17 = vector.load %arg2[%c0_16, %c1_17, %c0_18] : memref<16x3x4xf32, #tpu.memory_space<vmem>>, vector<16x1x4xf32>
    %18 = vector.shape_cast %17 : vector<16x1x4xf32> to vector<16x4xf32>
    %cst_19 = arith.constant dense<0.000000e+00> : vector<16x36xf32>
    %19 = tpu.matmul %18, %1, %cst_19 {dimension_numbers = #tpu.dot_dimension_numbers<[1], [0], [0], [1], [0, 0, 1, 1], [], []>} : vector<16x4xf32>, vector<4x36xf32>, vector<16x36xf32> -> vector<16x36xf32>
    %20 = arith.addf %16, %19 : vector<16x36xf32>
    %21 = vector.broadcast %2 : vector<1x36xf32> to vector<16x36xf32>
    %22 = arith.addf %20, %21 : vector<16x36xf32>
    %cst_20 = arith.constant 0.000000e+00 : f32
    %23 = vector.broadcast %cst_20 : f32 to vector<16x36xf32>
    %24 = arith.maximumf %22, %23 : vector<16x36xf32>
    %25 = arith.addf %13, %24 : vector<16x36xf32>
    %c0_21 = arith.constant 0 : index
    %c2 = arith.constant 2 : index
    %c0_22 = arith.constant 0 : index
    %26 = vector.load %arg1[%c0_21, %c2, %c0_22] : memref<16x3x32xf32, #tpu.memory_space<vmem>>, vector<16x1x32xf32>
    %27 = vector.shape_cast %26 : vector<16x1x32xf32> to vector<16x32xf32>
    %cst_23 = arith.constant dense<0.000000e+00> : vector<16x36xf32>
    %28 = tpu.matmul %27, %0, %cst_23 {dimension_numbers = #tpu.dot_dimension_numbers<[1], [0], [0], [1], [0, 0, 1, 1], [], []>} : vector<16x32xf32>, vector<32x36xf32>, vector<16x36xf32> -> vector<16x36xf32>
    %c0_24 = arith.constant 0 : index
    %c2_25 = arith.constant 2 : index
    %c0_26 = arith.constant 0 : index
    %29 = vector.load %arg2[%c0_24, %c2_25, %c0_26] : memref<16x3x4xf32, #tpu.memory_space<vmem>>, vector<16x1x4xf32>
    %30 = vector.shape_cast %29 : vector<16x1x4xf32> to vector<16x4xf32>
    %cst_27 = arith.constant dense<0.000000e+00> : vector<16x36xf32>
    %31 = tpu.matmul %30, %1, %cst_27 {dimension_numbers = #tpu.dot_dimension_numbers<[1], [0], [0], [1], [0, 0, 1, 1], [], []>} : vector<16x4xf32>, vector<4x36xf32>, vector<16x36xf32> -> vector<16x36xf32>
    %32 = arith.addf %28, %31 : vector<16x36xf32>
    %33 = vector.broadcast %2 : vector<1x36xf32> to vector<16x36xf32>
    %34 = arith.addf %32, %33 : vector<16x36xf32>
    %cst_28 = arith.constant 0.000000e+00 : f32
    %35 = vector.broadcast %cst_28 : f32 to vector<16x36xf32>
    %36 = arith.maximumf %34, %35 : vector<16x36xf32>
    %37 = arith.addf %25, %36 : vector<16x36xf32>
    %c0_29 = arith.constant 0 : index
    %c0_30 = arith.constant 0 : index
    %38 = vector.load %arg3[%c0_29, %c0_30] : memref<16x24xf32, #tpu.memory_space<vmem>>, vector<16x24xf32>
    %c0_31 = arith.constant 0 : index
    %c0_32 = arith.constant 0 : index
    %39 = vector.load %arg7[%c0_31, %c0_32] : memref<24x32xf32, #tpu.memory_space<vmem>>, vector<24x32xf32>
    %cst_33 = arith.constant dense<0.000000e+00> : vector<16x32xf32>
    %40 = tpu.matmul %38, %39, %cst_33 {dimension_numbers = #tpu.dot_dimension_numbers<[1], [0], [0], [1], [0, 0, 1, 1], [], []>} : vector<16x24xf32>, vector<24x32xf32>, vector<16x32xf32> -> vector<16x32xf32>
    %c0_34 = arith.constant 0 : index
    %c0_35 = arith.constant 0 : index
    %41 = vector.load %arg8[%c0_34, %c0_35] : memref<36x32xf32, #tpu.memory_space<vmem>>, vector<36x32xf32>
    %cst_36 = arith.constant dense<0.000000e+00> : vector<16x32xf32>
    %42 = tpu.matmul %37, %41, %cst_36 {dimension_numbers = #tpu.dot_dimension_numbers<[1], [0], [0], [1], [0, 0, 1, 1], [], []>} : vector<16x36xf32>, vector<36x32xf32>, vector<16x32xf32> -> vector<16x32xf32>
    %43 = arith.addf %40, %42 : vector<16x32xf32>
    %c0_37 = arith.constant 0 : index
    %c0_38 = arith.constant 0 : index
    %44 = vector.load %arg9[%c0_37, %c0_38] : memref<1x32xf32, #tpu.memory_space<vmem>>, vector<1x32xf32>
    %45 = vector.broadcast %44 : vector<1x32xf32> to vector<16x32xf32>
    %46 = arith.addf %43, %45 : vector<16x32xf32>
    %cst_39 = arith.constant 0.000000e+00 : f32
    %47 = vector.broadcast %cst_39 : f32 to vector<16x32xf32>
    %48 = arith.maximumf %46, %47 : vector<16x32xf32>
    %c0_40 = arith.constant 0 : index
    %c0_41 = arith.constant 0 : index
    %49 = vector.load %arg10[%c0_40, %c0_41] : memref<32x32xf32, #tpu.memory_space<vmem>>, vector<32x32xf32>
    %cst_42 = arith.constant dense<0.000000e+00> : vector<16x32xf32>
    %50 = tpu.matmul %48, %49, %cst_42 {dimension_numbers = #tpu.dot_dimension_numbers<[1], [0], [0], [1], [0, 0, 1, 1], [], []>} : vector<16x32xf32>, vector<32x32xf32>, vector<16x32xf32> -> vector<16x32xf32>
    %c0_43 = arith.constant 0 : index
    %c0_44 = arith.constant 0 : index
    %51 = vector.load %arg11[%c0_43, %c0_44] : memref<1x32xf32, #tpu.memory_space<vmem>>, vector<1x32xf32>
    %52 = vector.broadcast %51 : vector<1x32xf32> to vector<16x32xf32>
    %53 = arith.addf %50, %52 : vector<16x32xf32>
    %cst_45 = arith.constant 0.000000e+00 : f32
    %54 = vector.broadcast %cst_45 : f32 to vector<16x32xf32>
    %55 = arith.maximumf %53, %54 : vector<16x32xf32>
    %c0_46 = arith.constant 0 : index
    %c0_47 = arith.constant 0 : index
    %56 = vector.load %arg12[%c0_46, %c0_47] : memref<1x32xf32, #tpu.memory_space<vmem>>, vector<1x32xf32>
    %57 = vector.broadcast %56 : vector<1x32xf32> to vector<16x32xf32>
    %58 = arith.mulf %55, %57 : vector<16x32xf32>
    %cst_48 = arith.constant dense<0.000000e+00> : vector<16xf32>
    %59 = vector.multi_reduction <add>, %58, %cst_48 [1] : vector<16x32xf32> to vector<16xf32>
    %60 = vector.shape_cast %59 : vector<16xf32> to vector<16x1xf32>
    %c0_49 = arith.constant 0 : index
    %c0_50 = arith.constant 0 : index
    %61 = vector.load %arg13[%c0_49, %c0_50] : memref<1x1xf32, #tpu.memory_space<vmem>>, vector<1x1xf32>
    %62 = vector.broadcast %61 : vector<1x1xf32> to vector<16x1xf32>
    %63 = arith.addf %60, %62 : vector<16x1xf32>
    %c0_51 = arith.constant 0 : index
    %c0_52 = arith.constant 0 : index
    %64 = vector.load %arg14[%c0_51, %c0_52] : memref<16x1xf32, #tpu.memory_space<vmem>>, vector<16x1xf32>
    tpu.vector_store %arg14[%c0_51, %c0_52], %63 {strides = array<i32>} : memref<16x1xf32, #tpu.memory_space<vmem>>, vector<16x1xf32>,
    return
  }
  func.func @transform_0(%arg0: i32) -> (i32, i32, i32) {
    %c0_i32 = arith.constant 0 : i32
    %c0_i32_0 = arith.constant 0 : i32
    %c0_i32_1 = arith.constant 0 : i32
    return %arg0, %c0_i32, %c0_i32_0 : i32, i32, i32
  }
  func.func @transform_1(%arg0: i32) -> (i32, i32, i32) {
    %c0_i32 = arith.constant 0 : i32
    %c0_i32_0 = arith.constant 0 : i32
    %c0_i32_1 = arith.constant 0 : i32
    return %arg0, %c0_i32, %c0_i32_0 : i32, i32, i32
  }
  func.func @transform_2(%arg0: i32) -> (i32, i32) {
    %c0_i32 = arith.constant 0 : i32
    %c0_i32_0 = arith.constant 0 : i32
    return %arg0, %c0_i32 : i32, i32
  }
  func.func @transform_3(%arg0: i32) -> (i32, i32) {
    %c0_i32 = arith.constant 0 : i32
    %c0_i32_0 = arith.constant 0 : i32
    %c0_i32_1 = arith.constant 0 : i32
    return %c0_i32, %c0_i32_0 : i32, i32
  }
  func.func @transform_4(%arg0: i32) -> (i32, i32) {
    %c0_i32 = arith.constant 0 : i32
    %c0_i32_0 = arith.constant 0 : i32
    %c0_i32_1 = arith.constant 0 : i32
    return %c0_i32, %c0_i32_0 : i32, i32
  }
  func.func @transform_5(%arg0: i32) -> (i32, i32) {
    %c0_i32 = arith.constant 0 : i32
    %c0_i32_0 = arith.constant 0 : i32
    %c0_i32_1 = arith.constant 0 : i32
    return %c0_i32, %c0_i32_0 : i32, i32
  }
  func.func @transform_6(%arg0: i32) -> (i32, i32) {
    %c0_i32 = arith.constant 0 : i32
    %c0_i32_0 = arith.constant 0 : i32
    %c0_i32_1 = arith.constant 0 : i32
    return %c0_i32, %c0_i32_0 : i32, i32
  }
  func.func @transform_7(%arg0: i32) -> (i32, i32) {
    %c0_i32 = arith.constant 0 : i32
    %c0_i32_0 = arith.constant 0 : i32
    %c0_i32_1 = arith.constant 0 : i32
    return %c0_i32, %c0_i32_0 : i32, i32
  }
  func.func @transform_8(%arg0: i32) -> (i32, i32) {
    %c0_i32 = arith.constant 0 : i32
    %c0_i32_0 = arith.constant 0 : i32
    %c0_i32_1 = arith.constant 0 : i32
    return %c0_i32, %c0_i32_0 : i32, i32
  }
  func.func @transform_9(%arg0: i32) -> (i32, i32) {
    %c0_i32 = arith.constant 0 : i32
    %c0_i32_0 = arith.constant 0 : i32
    %c0_i32_1 = arith.constant 0 : i32
    return %c0_i32, %c0_i32_0 : i32, i32
  }
  func.func @transform_10(%arg0: i32) -> (i32, i32) {
    %c0_i32 = arith.constant 0 : i32
    %c0_i32_0 = arith.constant 0 : i32
    %c0_i32_1 = arith.constant 0 : i32
    return %c0_i32, %c0_i32_0 : i32, i32
  }
  func.func @transform_11(%arg0: i32) -> (i32, i32) {
    %c0_i32 = arith.constant 0 : i32
    %c0_i32_0 = arith.constant 0 : i32
    %c0_i32_1 = arith.constant 0 : i32
    return %c0_i32, %c0_i32_0 : i32, i32
  }
  func.func @transform_12(%arg0: i32) -> (i32, i32) {
    %c0_i32 = arith.constant 0 : i32
    %c0_i32_0 = arith.constant 0 : i32
    %c0_i32_1 = arith.constant 0 : i32
    return %c0_i32, %c0_i32_0 : i32, i32
  }
  func.func @transform_13(%arg0: i32) -> (i32, i32) {
    %c0_i32 = arith.constant 0 : i32
    %c0_i32_0 = arith.constant 0 : i32
    return %arg0, %c0_i32 : i32, i32
  }
}

</mosaic_0001>

<bundles_post_ra>
// kernel: qtran_qbase_forward.1
= control target key start
LH: loop header
LB: loop body
LE: loop exit
PB: predicated region body
PF: predicated region fallthrough
CT: control target
= control target key end

     0   :  { %vm140_vm0 = vcmask 1043456   ;;  %vm101_vm1 = vcmask 1041409   ;;  %vm104_vm2 = vcmask 1042434   ;;  %vm107_vm3 = vcmask 1043459   ;;  %s2007_s4 = inlined_call_operand.vmem [shape: f32[4,36], index: 4, kind: input, shape index: {}]   ;;  %s2008_s1 = inlined_call_operand.vmem [shape: f32[16,3,4], index: 1, kind: input, shape index: {}]   ;;  %s2009_s3 = inlined_call_operand.vmem [shape: f32[32,36], index: 3, kind: input, shape index: {}]   ;;  %s2010_s0 = inlined_call_operand.vmem [shape: f32[16,3,32], index: 0, kind: input, shape index: {}]   ;;  %s2011_s7 = inlined_call_operand.vmem [shape: f32[36,32], index: 7, kind: input, shape index: {}]   ;;  %s2012_s6 = inlined_call_operand.vmem [shape: f32[24,32], index: 6, kind: input, shape index: {}]   ;;  %s2013_s9 = inlined_call_operand.vmem [shape: f32[32,32], index: 9, kind: input, shape index: {}]   ;;  %s2014_s5 = inlined_call_operand.vmem [shape: f32[1,36], index: 5, kind: input, shape index: {}]   ;;  %s2015_s2 = inlined_call_operand.vmem [shape: f32[16,24], index: 2, kind: input, shape index: {}]   ;;  %s2016_s8 = inlined_call_operand.vmem [shape: f32[1,32], index: 8, kind: input, shape index: {}]   ;;  %s2017_s12 = inlined_call_operand.<no memory space> [shape: f32[1,1], index: 12, kind: input, shape index: {}]   ;;  %s2018_s10 = inlined_call_operand.vmem [shape: f32[1,32], index: 10, kind: input, shape index: {}]   ;;  %s2019_s11 = inlined_call_operand.vmem [shape: f32[1,32], index: 11, kind: input, shape index: {}]   ;;  %s2020_s13 = inlined_call_operand.vmem [shape: f32[16,1], index: 13, kind: output, shape index: {}]  }
   0x1   :  { %v1512_v0 = vld [vmem:[%s2007_s4] sm:$0xf]  ;;  %v69_v2 = vld [vmem:[%s2008_s1 + $0x4] sm:$0x1]  ;;  %v70_v3 = vld [vmem:[%s2008_s1 + $0x8] sm:$0x1] }
   0x2   :  { %v68_v1 = vld [vmem:[%s2008_s1] sm:$0x1]  ;;  %1306 = vmatprep.subr.msk.mxu0 %vm140_vm0, %v1512_v0  ;;  %1322 = vmatprep.subr.msk.mxu1 %vm140_vm0, %v1512_v0  ;;  %v71_v4 = vld [vmem:[%s2008_s1 + $0xc] sm:$0x1]  ;;  %v72_v5 = vld [vmem:[%s2008_s1 + $0x10] sm:$0x1] }
   0x3   :  { %1307 = vmatpush3.msk.msra.mxu0 %vm140_vm0, %v1512_v0  ;;  %v73_v6 = vld [vmem:[%s2008_s1 + $0x14] sm:$0x1]  ;;  %v74_v7 = vld [vmem:[%s2008_s1 + $0x18] sm:$0x1]  ;;  %v75_v8 = vld [vmem:[%s2008_s1 + $0x1c] sm:$0x1]  ;;  %1323 = vmatpush3.msk.msra.mxu1 %vm140_vm0, %v1512_v0 }
   0x4   :  { %v100_v9 = vrot.slane %v69_v2, 7  ;;  %v103_v10 = vrot.slane %v70_v3, 6  ;;  %v106_v11 = vrot.slane %v71_v4, 5  ;;  %v109_v12 = vrot.slane %v72_v5, 4  ;;  %v46_v13 = vld [vmem:[%s2009_s3] sm:$0xff]  ;;  %v47_v14 = vld [vmem:[%s2009_s3 + $0x8] sm:$0xff] }
   0x5   :  { %vm110_vm4 = vcmask 1044484   ;;  %v112_v15 = vrot.slane %v73_v6, 3  ;;  %vm113_vm5 = vcmask 1045509   ;;  %v115_v16 = vrot.slane %v74_v7, 2  ;;  %v369_v17 = vld [vmem:[%s2008_s1 + $0x1] sm:$0x1] }
   0x6   :  { %v102_v18 = vsel %vm101_vm1, %v100_v9, %v68_v1  ;;  %vm116_vm6 = vcmask 1046534   ;;  %v118_v19 = vrot.slane %v75_v8, 1  ;;  %vm119_vm7 = vcmask 1047559   ;;  %v370_v20 = vld [vmem:[%s2008_s1 + $0x5] sm:$0x1]  ;;  %v48_v47 = vld [vmem:[%s2009_s3 + $0x10] sm:$0xff] }
   0x7   :  { %v105_v21 = vsel %vm104_vm2, %v103_v10, %v102_v18  ;;  %vm135_vm8 = vcmask 31744   ;;  %v1560_v22 = vpack.c.bf16 %v47_v14, %v46_v13  ;;  %v371_v23 = vld [vmem:[%s2008_s1 + $0x9] sm:$0x1]  ;;  %v372_v24 = vld [vmem:[%s2008_s1 + $0xd] sm:$0x1]  ;;  %v401_v25 = vrot.slane %v370_v20, 7 }
   0x8   :  { %v108_v26 = vsel %vm107_vm3, %v106_v11, %v105_v21  ;;  %v373_v27 = vld [vmem:[%s2008_s1 + $0x11] sm:$0x1]  ;;  %v374_v28 = vld [vmem:[%s2008_s1 + $0x15] sm:$0x1]  ;;  %v375_v29 = vld [vmem:[%s2008_s1 + $0x19] sm:$0x1] }
   0x9   :  { %v111_v30 = vsel %vm110_vm4, %v109_v12, %v108_v26  ;;  %1388 = vmatprep.subr.bf16.mxu0 %v1560_v22  ;;  %v376_v31 = vld [vmem:[%s2008_s1 + $0x1d] sm:$0x1]  ;;  %v402_v32 = vsel %vm101_vm1, %v401_v25, %v369_v17  ;;  %v403_v33 = vrot.slane %v371_v23, 6  ;;  %v405_v34 = vrot.slane %v372_v24, 5  ;;  %v76_v35 = vld [vmem:[%s2008_s1 + $0x20] sm:$0x1]  ;;  %1396 = vmatprep.subr.bf16.mxu1 %v1560_v22 }
   0xa   :  { %v114_v36 = vsel %vm113_vm5, %v112_v15, %v111_v30  ;;  %v407_v37 = vrot.slane %v373_v27, 4  ;;  %v409_v38 = vrot.slane %v374_v28, 3  ;;  %v411_v39 = vrot.slane %v375_v29, 2  ;;  %v77_v40 = vld [vmem:[%s2008_s1 + $0x24] sm:$0x1]  ;;  %v49_v48 = vld [vmem:[%s2009_s3 + $0x18] sm:$0xff] }
   0xb   :  { %v117_v41 = vsel %vm116_vm6, %v115_v16, %v114_v36  ;;  %v404_v42 = vsel %vm104_vm2, %v403_v33, %v402_v32  ;;  %v413_v43 = vrot.slane %v376_v31, 1  ;;  %v78_v44 = vld [vmem:[%s2008_s1 + $0x28] sm:$0x1]  ;;  %v79_v45 = vld [vmem:[%s2008_s1 + $0x2c] sm:$0x1]  ;;  %v121_v46 = vrot.slane %v77_v40, 7 }
   0xc   :  { %v120_v49 = vsel %vm119_vm7, %v118_v19, %v117_v41  ;;  %v406_v50 = vsel %vm107_vm3, %v405_v34, %v404_v42  ;;  %v80_v51 = vld [vmem:[%s2008_s1 + $0x30] sm:$0x1]  ;;  %v81_v52 = vld [vmem:[%s2008_s1 + $0x34] sm:$0x1]  ;;  %v82_v53 = vld [vmem:[%s2008_s1 + $0x38] sm:$0x1]  ;;  %v1649_v13 = vpack.c.bf16 %v49_v48, %v48_v47 }
   0xd   :  { %1308 = vmatprep.mubr.msk.f32.mxu0 %vm135_vm8, %v120_v49  ;;  %v408_v54 = vsel %vm110_vm4, %v407_v37, %v406_v50  ;;  %v83_v55 = vld [vmem:[%s2008_s1 + $0x3c] sm:$0x1]  ;;  %v122_v56 = vsel %vm101_vm1, %v121_v46, %v76_v35  ;;  %v123_v57 = vrot.slane %v78_v44, 6  ;;  %v125_v58 = vrot.slane %v79_v45, 5  ;;  %v377_v59 = vld [vmem:[%s2008_s1 + $0x21] sm:$0x1] }
   0xe   :  { %v410_v60 = vsel %vm113_vm5, %v409_v38, %v408_v54  ;;  %v127_v61 = vrot.slane %v80_v51, 4  ;;  %v129_v62 = vrot.slane %v81_v52, 3  ;;  %v131_v63 = vrot.slane %v82_v53, 2  ;;  %v378_v1 = vld [vmem:[%s2008_s1 + $0x25] sm:$0x1] }
   0xf   :  { %v412_v2 = vsel %vm116_vm6, %v411_v39, %v410_v60  ;;  %v124_v3 = vsel %vm104_vm2, %v123_v57, %v122_v56  ;;  %v133_v4 = vrot.slane %v83_v55, 1  ;;  %v379_v5 = vld [vmem:[%s2008_s1 + $0x29] sm:$0x1]  ;;  %v380_v6 = vld [vmem:[%s2008_s1 + $0x2d] sm:$0x1]  ;;  %v415_v7 = vrot.slane %v378_v1, 7 }
  0x10   :  { %v414_v8 = vsel %vm119_vm7, %v413_v43, %v412_v2  ;;  %v126_v9 = vsel %vm107_vm3, %v125_v58, %v124_v3  ;;  %v381_v10 = vld [vmem:[%s2008_s1 + $0x31] sm:$0x1]  ;;  %v382_v11 = vld [vmem:[%s2008_s1 + $0x35] sm:$0x1]  ;;  %v383_v12 = vld [vmem:[%s2008_s1 + $0x39] sm:$0x1] }
  0x11   :  { %1324 = vmatprep.mubr.msk.f32.mxu1 %vm135_vm8, %v414_v8  ;;  %v128_v14 = vsel %vm110_vm4, %v127_v61, %v126_v9  ;;  %v384_v15 = vld [vmem:[%s2008_s1 + $0x3d] sm:$0x1]  ;;  %v416_v16 = vsel %vm101_vm1, %v415_v7, %v377_v59  ;;  %v417_v17 = vrot.slane %v379_v5, 6  ;;  %v419_v18 = vrot.slane %v380_v6, 5  ;;  %v52_v19 = vld [vmem:[%s2010_s0] sm:$0x1] }
  0x12   :  { %v130_v20 = vsel %vm113_vm5, %v129_v62, %v128_v14  ;;  %v421_v21 = vrot.slane %v381_v10, 4  ;;  %v423_v23 = vrot.slane %v382_v11, 3  ;;  %v425_v24 = vrot.slane %v383_v12, 2  ;;  %v53_v25 = vld [vmem:[%s2010_s0 + $0x4] sm:$0x1] }
  0x13   :  { %v132_v26 = vsel %vm116_vm6, %v131_v63, %v130_v20  ;;  %v418_v27 = vsel %vm104_vm2, %v417_v17, %v416_v16  ;;  %v427_v28 = vrot.slane %v384_v15, 1  ;;  %v54_v29 = vld [vmem:[%s2010_s0 + $0x8] sm:$0x1]  ;;  %v55_v30 = vld [vmem:[%s2010_s0 + $0xc] sm:$0x1]  ;;  %v235_v31 = vrot.slane %v53_v25, 7 }
  0x14   :  { %v134_v32 = vsel %vm119_vm7, %v133_v4, %v132_v26  ;;  %v420_v33 = vsel %vm107_vm3, %v419_v18, %v418_v27  ;;  %v56_v34 = vld [vmem:[%s2010_s0 + $0x10] sm:$0x1]  ;;  %v57_v35 = vld [vmem:[%s2010_s0 + $0x14] sm:$0x1]  ;;  %v58_v36 = vld [vmem:[%s2010_s0 + $0x18] sm:$0x1] }
  0x15   :  { %1309 = vmatmul.mubr.msk.f32.vlgmr.msra.gmra.mrb[0].mxu0 %vm135_vm8, %v134_v32  ;;  %v422_v37 = vsel %vm110_vm4, %v421_v21, %v420_v33  ;;  %v59_v38 = vld [vmem:[%s2010_s0 + $0x1c] sm:$0x1]  ;;  %v236_v39 = vsel %vm101_vm1, %v235_v31, %v52_v19  ;;  %v237_v40 = vrot.slane %v54_v29, 6  ;;  %v239_v41 = vrot.slane %v55_v30, 5  ;;  %v353_v45 = vld [vmem:[%s2010_s0 + $0x1] sm:$0x1] }
  0x16   :  { %1390 = vmatpush3.bf16.msra.mxu0 %v1560_v22  ;;  %v424_v42 = vsel %vm113_vm5, %v423_v23, %v422_v37  ;;  %v241_v43 = vrot.slane %v56_v34, 4  ;;  %v243_v44 = vrot.slane %v57_v35, 3  ;;  %v354_v46 = vld [vmem:[%s2010_s0 + $0x5] sm:$0x1]  ;;  %v245_v49 = vrot.slane %v58_v36, 2 }
  0x17   :  { %v426_v47 = vsel %vm116_vm6, %v425_v24, %v424_v42  ;;  %1392 = vmatprep.subr.bf16.mxu0 %v1649_v13  ;;  %v238_v48 = vsel %vm104_vm2, %v237_v40, %v236_v39  ;;  %v247_v50 = vrot.slane %v59_v38, 1  ;;  %v355_v51 = vld [vmem:[%s2010_s0 + $0x9] sm:$0x1]  ;;  %v356_v52 = vld [vmem:[%s2010_s0 + $0xd] sm:$0x1]  ;;  %v524_v60 = vrot.slane %v354_v46, 7 }
  0x18   :  { %v428_v53 = vsel %vm119_vm7, %v427_v28, %v426_v47  ;;  %v240_v54 = vsel %vm107_vm3, %v239_v41, %v238_v48  ;;  %v357_v55 = vld [vmem:[%s2010_s0 + $0x11] sm:$0x1]  ;;  %v358_v56 = vld [vmem:[%s2010_s0 + $0x15] sm:$0x1]  ;;  %v359_v57 = vld [vmem:[%s2010_s0 + $0x19] sm:$0x1] }
  0x19   :  { %1325 = vmatmul.mubr.msk.f32.vlgmr.msra.gmra.mrb[0].mxu1 %vm135_vm8, %v428_v53  ;;  %v242_v58 = vsel %vm110_vm4, %v241_v43, %v240_v54  ;;  %v360_v59 = vld [vmem:[%s2010_s0 + $0x1d] sm:$0x1]  ;;  %v526_v61 = vrot.slane %v355_v51, 6  ;;  %v528_v62 = vrot.slane %v356_v52, 5  ;;  %vm263_vm9 = vcmask 261120  }
  0x1a   :  { %1398 = vmatpush3.bf16.msra.mxu1 %v1560_v22  ;;  %1394 = vmatpush3.bf16.msra.mxu0 %v1649_v13  ;;  %v244_v63 = vsel %vm113_vm5, %v243_v44, %v242_v58  ;;  %v530_v1 = vrot.slane %v357_v55, 4  ;;  %v532_v2 = vrot.slane %v358_v56, 3  ;;  %v60_v3 = vld [vmem:[%s2010_s0 + $0x20] sm:$0x1]  ;;  %v525_v5 = vsel %vm101_vm1, %v524_v60, %v353_v45  ;;  %v61_v8 = vld [vmem:[%s2010_s0 + $0x24] sm:$0x1] }
  0x1b   :  { %1400 = vmatprep.subr.bf16.mxu1 %v1649_v13  ;;  %v246_v4 = vsel %vm116_vm6, %v245_v49, %v244_v63  ;;  %v534_v6 = vrot.slane %v359_v57, 2  ;;  %v536_v7 = vrot.slane %v360_v59, 1  ;;  %1338 = vmatprep.subr.msk.mxu0 %vm140_vm0, %v1512_v0  ;;  %v62_v9 = vld [vmem:[%s2010_s0 + $0x28] sm:$0x1]  ;;  %v527_v11 = vsel %vm104_vm2, %v526_v61, %v525_v5  ;;  %v63_v12 = vld [vmem:[%s2010_s0 + $0x2c] sm:$0x1] }
  0x1c   :  { %v248_v10 = vsel %vm119_vm7, %v247_v50, %v246_v4  ;;  %v64_v14 = vld [vmem:[%s2010_s0 + $0x30] sm:$0x1]  ;;  %v65_v15 = vld [vmem:[%s2010_s0 + $0x34] sm:$0x1]  ;;  %v529_v16 = vsel %vm107_vm3, %v528_v62, %v527_v11  ;;  %v66_v17 = vld [vmem:[%s2010_s0 + $0x38] sm:$0x1] }
  0x1d   :  { %1319 = vmatprep.mubr.msk.f32.mxu0 %vm263_vm9, %v248_v10  ;;  %v67_v18 = vld [vmem:[%s2010_s0 + $0x3c] sm:$0x1]  ;;  %v249_v19 = vrot.slane %v61_v8, 7  ;;  %v251_v20 = vrot.slane %v62_v9, 6  ;;  %v531_v21 = vsel %vm110_vm4, %v530_v1, %v529_v16  ;;  %v253_v23 = vrot.slane %v63_v12, 5 }
  0x1e   :  { %1402 = vmatpush3.bf16.msra.mxu1 %v1649_v13  ;;  %v255_v24 = vrot.slane %v64_v14, 4  ;;  %v257_v25 = vrot.slane %v65_v15, 3  ;;  %v361_v26 = vld [vmem:[%s2010_s0 + $0x21] sm:$0x1]  ;;  %v533_v27 = vsel %vm113_vm5, %v532_v2, %v531_v21  ;;  %v259_v29 = vrot.slane %v66_v17, 2 }
  0x1f   :  { %v250_v28 = vsel %vm101_vm1, %v249_v19, %v60_v3  ;;  %v261_v30 = vrot.slane %v67_v18, 1  ;;  %v362_v31 = vld [vmem:[%s2010_s0 + $0x25] sm:$0x1]  ;;  %v363_v32 = vld [vmem:[%s2010_s0 + $0x29] sm:$0x1]  ;;  %v535_v33 = vsel %vm116_vm6, %v534_v6, %v533_v27  ;;  %vm931_vm10 = vcmask 293888  }
  0x20   :  { %v252_v34 = vsel %vm104_vm2, %v251_v20, %v250_v28  ;;  %v364_v35 = vld [vmem:[%s2010_s0 + $0x2d] sm:$0x1]  ;;  %v365_v36 = vld [vmem:[%s2010_s0 + $0x31] sm:$0x1]  ;;  %v366_v37 = vld [vmem:[%s2010_s0 + $0x35] sm:$0x1]  ;;  %v537_v38 = vsel %vm119_vm7, %v536_v7, %v535_v33 }
  0x21   :  { %v254_v39 = vsel %vm107_vm3, %v253_v23, %v252_v34  ;;  %v367_v40 = vld [vmem:[%s2010_s0 + $0x39] sm:$0x1]  ;;  %v368_v41 = vld [vmem:[%s2010_s0 + $0x3d] sm:$0x1]  ;;  %v538_v42 = vrot.slane %v362_v31, 7  ;;  %v540_v43 = vrot.slane %v363_v32, 6  ;;  %1335 = vmatprep.mubr.msk.f32.mxu1 %vm263_vm9, %v537_v38 }
  0x22   :  { %v256_v44 = vsel %vm110_vm4, %v255_v24, %v254_v39  ;;  %v542_v45 = vrot.slane %v364_v35, 5  ;;  %v544_v46 = vrot.slane %v365_v36, 4  ;;  %v546_v47 = vrot.slane %v366_v37, 3  ;;  %v653_v48 = vld [vmem:[%s2008_s1 + $0x2] sm:$0x1] }
  0x23   :  { %v258_v49 = vsel %vm113_vm5, %v257_v25, %v256_v44  ;;  %v539_v50 = vsel %vm101_vm1, %v538_v42, %v361_v26  ;;  %v548_v51 = vrot.slane %v367_v40, 2  ;;  %v550_v52 = vrot.slane %v368_v41, 1  ;;  %v654_v53 = vld [vmem:[%s2008_s1 + $0x6] sm:$0x1]  ;;  %v655_v54 = vld [vmem:[%s2008_s1 + $0xa] sm:$0x1] }
  0x24   :  { %v260_v55 = vsel %vm116_vm6, %v259_v29, %v258_v49  ;;  %v541_v56 = vsel %vm104_vm2, %v540_v43, %v539_v50  ;;  %v656_v57 = vld [vmem:[%s2008_s1 + $0xe] sm:$0x1]  ;;  %v657_v58 = vld [vmem:[%s2008_s1 + $0x12] sm:$0x1]  ;;  %v658_v59 = vld [vmem:[%s2008_s1 + $0x16] sm:$0x1] }
  0x25   :  { %v262_v60 = vsel %vm119_vm7, %v261_v30, %v260_v55  ;;  %v543_v61 = vsel %vm107_vm3, %v542_v45, %v541_v56  ;;  %v659_v62 = vld [vmem:[%s2008_s1 + $0x1a] sm:$0x1]  ;;  %v660_v63 = vld [vmem:[%s2008_s1 + $0x1e] sm:$0x1]  ;;  %v685_v1 = vrot.slane %v654_v53, 7  ;;  %v687_v2 = vrot.slane %v655_v54, 6 }
  0x26   :  { %1320 = vmatmul.mubr.msk.f32.vlgmr.msra.gmra.mrb[0].mxu0 %vm263_vm9, %v262_v60  ;;  %v545_v3 = vsel %vm110_vm4, %v544_v46, %v543_v61  ;;  %v689_v4 = vrot.slane %v656_v57, 5  ;;  %v691_v5 = vrot.slane %v657_v58, 4  ;;  %v693_v6 = vrot.slane %v658_v59, 3  ;;  %v661_v7 = vld [vmem:[%s2008_s1 + $0x22] sm:$0x1] }
  0x27   :  { %v547_v8 = vsel %vm113_vm5, %v546_v47, %v545_v3  ;;  %1339 = vmatpush3.msk.msra.mxu0 %vm140_vm0, %v1512_v0  ;;  %v686_v9 = vsel %vm101_vm1, %v685_v1, %v653_v48  ;;  %v695_v10 = vrot.slane %v659_v62, 2  ;;  %v697_v11 = vrot.slane %v660_v63, 1  ;;  %v662_v12 = vld [vmem:[%s2008_s1 + $0x26] sm:$0x1]  ;;  %v663_v14 = vld [vmem:[%s2008_s1 + $0x2a] sm:$0x1] }
  0x28   :  { %v549_v15 = vsel %vm116_vm6, %v548_v51, %v547_v8  ;;  %v688_v16 = vsel %vm104_vm2, %v687_v2, %v686_v9  ;;  %1404 = vmatprep.subr.bf16.mxu0 %v1560_v22  ;;  %v664_v0 = vld [vmem:[%s2008_s1 + $0x2e] sm:$0x1]  ;;  %v665_v17 = vld [vmem:[%s2008_s1 + $0x32] sm:$0x1]  ;;  %v666_v18 = vld [vmem:[%s2008_s1 + $0x36] sm:$0x1] }
  0x29   :  { %v551_v19 = vsel %vm119_vm7, %v550_v52, %v549_v15  ;;  %v690_v20 = vsel %vm107_vm3, %v689_v4, %v688_v16  ;;  %v667_v21 = vld [vmem:[%s2008_s1 + $0x3a] sm:$0x1]  ;;  %v668_v23 = vld [vmem:[%s2008_s1 + $0x3e] sm:$0x1]  ;;  %v699_v24 = vrot.slane %v662_v12, 7  ;;  %v701_v25 = vrot.slane %v663_v14, 6 }
  0x2a   :  { %1336 = vmatmul.mubr.msk.f32.vlgmr.msra.gmra.mrb[0].mxu1 %vm263_vm9, %v551_v19  ;;  %v692_v26 = vsel %vm110_vm4, %v691_v5, %v690_v20  ;;  %v703_v27 = vrot.slane %v664_v0, 5  ;;  %v705_v28 = vrot.slane %v665_v17, 4  ;;  %v707_v29 = vrot.slane %v666_v18, 3  ;;  %v637_v30 = vld [vmem:[%s2010_s0 + $0x2] sm:$0x1] }
  0x2b   :  { %v694_v31 = vsel %vm113_vm5, %v693_v6, %v692_v26  ;;  %v700_v32 = vsel %vm101_vm1, %v699_v24, %v661_v7  ;;  %v709_v33 = vrot.slane %v667_v21, 2  ;;  %v711_v34 = vrot.slane %v668_v23, 1  ;;  %v638_v35 = vld [vmem:[%s2010_s0 + $0x6] sm:$0x1]  ;;  %v639_v36 = vld [vmem:[%s2010_s0 + $0xa] sm:$0x1] }
  0x2c   :  { %v696_v37 = vsel %vm116_vm6, %v695_v10, %v694_v31  ;;  %v702_v38 = vsel %vm104_vm2, %v701_v25, %v700_v32  ;;  %v640_v39 = vld [vmem:[%s2010_s0 + $0xe] sm:$0x1]  ;;  %v641_v40 = vld [vmem:[%s2010_s0 + $0x12] sm:$0x1]  ;;  %v642_v41 = vld [vmem:[%s2010_s0 + $0x16] sm:$0x1] }
  0x2d   :  { %v698_v42 = vsel %vm119_vm7, %v697_v11, %v696_v37  ;;  %v704_v43 = vsel %vm107_vm3, %v703_v27, %v702_v38  ;;  %v643_v44 = vld [vmem:[%s2010_s0 + $0x1a] sm:$0x1]  ;;  %v644_v45 = vld [vmem:[%s2010_s0 + $0x1e] sm:$0x1]  ;;  %v808_v46 = vrot.slane %v638_v35, 7  ;;  %v810_v47 = vrot.slane %v639_v36, 6 }
  0x2e   :  { %1340 = vmatprep.mubr.msk.f32.mxu0 %vm135_vm8, %v698_v42  ;;  %v706_v48 = vsel %vm110_vm4, %v705_v28, %v704_v43  ;;  %v812_v49 = vrot.slane %v640_v39, 5  ;;  %v814_v50 = vrot.slane %v641_v40, 4  ;;  %v816_v51 = vrot.slane %v642_v41, 3  ;;  %v645_v52 = vld [vmem:[%s2010_s0 + $0x22] sm:$0x1]  ;;  %v927_v24 = vld [vmem:[%s2011_s7 + $0x8] sm:$0xff] }
  0x2f   :  { %v708_v53 = vsel %vm113_vm5, %v707_v29, %v706_v48  ;;  %v809_v54 = vsel %vm101_vm1, %v808_v46, %v637_v30  ;;  %v818_v55 = vrot.slane %v643_v44, 2  ;;  %v820_v56 = vrot.slane %v644_v45, 1  ;;  %v646_v57 = vld [vmem:[%s2010_s0 + $0x26] sm:$0x1]  ;;  %v647_v58 = vld [vmem:[%s2010_s0 + $0x2a] sm:$0x1] }
  0x30   :  { %v710_v59 = vsel %vm116_vm6, %v709_v33, %v708_v53  ;;  %v811_v60 = vsel %vm104_vm2, %v810_v47, %v809_v54  ;;  %v648_v61 = vld [vmem:[%s2010_s0 + $0x2e] sm:$0x1]  ;;  %v649_v62 = vld [vmem:[%s2010_s0 + $0x32] sm:$0x1]  ;;  %v650_v63 = vld [vmem:[%s2010_s0 + $0x36] sm:$0x1] }
  0x31   :  { %v712_v1 = vsel %vm119_vm7, %v711_v34, %v710_v59  ;;  %v813_v2 = vsel %vm107_vm3, %v812_v49, %v811_v60  ;;  %v651_v3 = vld [vmem:[%s2010_s0 + $0x3a] sm:$0x1]  ;;  %v822_v4 = vrot.slane %v646_v57, 7  ;;  %v824_v5 = vrot.slane %v647_v58, 6  ;;  %v652_v7 = vld [vmem:[%s2010_s0 + $0x3e] sm:$0x1] }
  0x32   :  { %1341 = vmatmul.mubr.msk.f32.vlgmr.msra.gmra.mrb[2].mxu0 %vm135_vm8, %v712_v1  ;;  %v815_v6 = vsel %vm110_vm4, %v814_v50, %v813_v2  ;;  %v826_v8 = vrot.slane %v648_v61, 5  ;;  %v828_v9 = vrot.slane %v649_v62, 4  ;;  %v830_v12 = vrot.slane %v650_v63, 3  ;;  %v926_v23 = vld [vmem:[%s2011_s7] sm:$0xff]  ;;  %v929_v26 = vld [vmem:[%s2011_s7 + $0x18] sm:$0xff]  ;;  %v924_v30 = vld [vmem:[%s2012_s6 + $0x8] sm:$0xff] }
  0x33   :  { %1406 = vmatpush3.bf16.msra.mxu0 %v1560_v22  ;;  %v817_v10 = vsel %vm113_vm5, %v816_v51, %v815_v6  ;;  %v823_v11 = vsel %vm101_vm1, %v822_v4, %v645_v52  ;;  %v832_v16 = vrot.slane %v651_v3, 2  ;;  %v834_v18 = vrot.slane %v652_v7, 1  ;;  %v930_v28 = vld [vmem:[%s2011_s7 + $0x20] sm:$0xf]  ;;  %v1110_v33 = vld [vmem:[%s2013_s9 + $0x8] sm:$0xff]  ;;  %v925_v59 = vld [vmem:[%s2012_s6 + $0x10] sm:$0xff] }
  0x34   :  { %1408 = vmatprep.subr.bf16.mxu0 %v1649_v13  ;;  %v819_v14 = vsel %vm116_vm6, %v818_v55, %v817_v10  ;;  %v825_v15 = vsel %vm104_vm2, %v824_v5, %v823_v11  ;;  %v1411_v25 = vpack.c.bf16 %v927_v24, %v926_v23  ;;  %v923_v29 = vld [vmem:[%s2012_s6] sm:$0xff]  ;;  %vm1016_vm11 = vcmask 195584   ;;  %v922_v60 = vld [vmem:[%s2015_s2 + $0x8] sm:$0xff]  ;;  %v1111_v61 = vld [vmem:[%s2013_s9 + $0x10] sm:$0xff] }
  0x35   :  { %v821_v0 = vsel %vm119_vm7, %v820_v56, %v819_v14  ;;  %v827_v17 = vsel %vm107_vm3, %v826_v8, %v825_v15  ;;  %v1419_v31 = vpack.c.bf16 %v924_v30, %v923_v29  ;;  %v1109_v32 = vld [vmem:[%s2013_s9] sm:$0xff]  ;;  %v1112_v62 = vld [vmem:[%s2013_s9 + $0x18] sm:$0xff]  ;;  %v18_v8 = vstv %s2017_s12 }
  0x36   :  { %1351 = vmatprep.mubr.msk.f32.mxu0 %vm263_vm9, %v821_v0  ;;  %v829_v22 = vsel %vm110_vm4, %v828_v9, %v827_v17  ;;  %1412 = vmatprep.subr.bf16.mxu1 %v1411_v25  ;;  %v1423_v34 = vpack.c.bf16 %v1110_v33, %v1109_v32  ;;  %v1239_v35 = vld [vmem:[%s2014_s5] ss:$0 sm:$0xff]  ;;  %v1427_v63 = vpack.c.bf16 %v1112_v62, %v1111_v61  ;;  %vm1227_vm12 = vcmask 7168  }
  0x37   :  { %1410 = vmatpush3.bf16.msra.mxu0 %v1649_v13  ;;  %v831_v19 = vsel %vm113_vm5, %v830_v12, %v829_v22  ;;  %1414 = vmatpush3.bf16.msra.mxu1 %v1411_v25  ;;  %v928_v13 = vld [vmem:[%s2011_s7 + $0x10] sm:$0xff]  ;;  %v921_v58 = vld [vmem:[%s2015_s2] sm:$0xff]  ;;  %19 = vst [vmem:[#allocation2] sm:$0x1] %v18_v8 }
  0x38   :  { %v833_v20 = vsel %vm116_vm6, %v832_v16, %v831_v19  ;;  %v1415_v27 = vpack.c.bf16 %v929_v26, %v928_v13  ;;  %1424 = vmatprep.subr.bf16.mxu0 %v1423_v34  ;;  %v1255_v1 = vld [vmem:[%s2016_s8] ss:$0 sm:$0xff] }
  0x39   :  { %v835_v21 = vsel %vm119_vm7, %v834_v18, %v833_v20  ;;  %v1256_v9 = vld [vmem:[%s2018_s10] ss:$0 sm:$0xff] }
  0x3a   :  { %1352 = vmatmul.mubr.msk.f32.vlgmr.msra.gmra.mrb[2].mxu0 %vm263_vm9, %v835_v21  ;;  %1416 = vmatprep.subr.bf16.mxu1 %v1415_v27  ;;  %v1259_v15 = vld [vmem:[%s2019_s11] ss:$0 sm:$0xff] }
  0x3b   :  { %1418 = vmatpush3.bf16.msra.mxu1 %v1415_v27  ;;  %1426 = vmatpush3.bf16.msra.mxu0 %v1423_v34 }
  0x3c   :  { %1362 = vmatprep.subr.msk.mxu1 %vm140_vm0, %v930_v28  ;;  %1428 = vmatprep.subr.bf16.mxu0 %v1427_v63 }
  0x3e   :  { %v1260_v20 = vld [vmem:[#allocation2] ss:$0 sm:$0xff] }
  0x3f   :  { %1363 = vmatpush3.msk.msra.mxu1 %vm140_vm0, %v930_v28  ;;  %1430 = vmatpush3.bf16.msra.mxu0 %v1427_v63 }
  0x40   :  { %1420 = vmatprep.subr.bf16.mxu1 %v1419_v31 }
  0xf9   :  { %v1321_v36 = vpop.f32.mrb[0].mxu0 }
  0xfa   :  { %v350_v37 = vadd.f32 %v1321_v36, %v1239_v35  ;;  %v334_v38 = vpop.f32.mrb[1].mxu0 }
  0xfb   :  { %v349_v39 = vadd.f32 %v1239_v35, %v334_v38 }
  0xfc   :  { %v352_v41 = vmax.f32 %v350_v37, 0.0 }
  0xfd   :  { %v1337_v40 = vpop.f32.mrb[0].mxu1  ;;  %v351_v44 = vmax.f32 %v349_v39, 0.0 }
  0xfe   :  { %v632_v42 = vadd.f32 %v1337_v40, %v1239_v35  ;;  %v622_v43 = vpop.f32.mrb[1].mxu1 }
  0xff   :  { %v631_v45 = vadd.f32 %v1239_v35, %v622_v43 }
 0x100   :  { %v634_v46 = vmax.f32 %v632_v42, 0.0 }
 0x101   :  { %v633_v47 = vmax.f32 %v631_v45, 0.0 }
 0x102   :  { %v636_v48 = vadd.f32 %v634_v46, %v352_v41 }
 0x103   :  { %v635_v49 = vadd.f32 %v633_v47, %v351_v44 }
 0x10d   :  { %v1353_v50 = vpop.f32.mrb[2].mxu0 }
 0x10e   :  { %v916_v51 = vadd.f32 %v1353_v50, %v1239_v35  ;;  %v906_v52 = vpop.f32.mrb[3].mxu0 }
 0x10f   :  { %v915_v53 = vadd.f32 %v1239_v35, %v906_v52 }
 0x110   :  { %v918_v54 = vmax.f32 %v916_v51, 0.0 }
 0x111   :  { %v917_v55 = vmax.f32 %v915_v53, 0.0 }
 0x112   :  { %v920_v56 = vadd.f32 %v918_v54, %v636_v48 }
 0x113   :  { %v919_v57 = vadd.f32 %v917_v55, %v635_v49 }
 0x115   :  { %1364 = vmatprep.mubr.msk.f32.mxu1 %vm931_vm10, %v919_v57 }
 0x116   :  { %1365 = vmatmul.mubr.msk.f32.vlgmr.msra.gmra.mrb[2].mxu1 %vm931_vm10, %v920_v56 }
 0x117   :  { %1422 = vmatpush3.bf16.msra.mxu1 %v1419_v31  ;;  %1373 = vmatprep.mubr.msk.f32.mxu1 %vm1016_vm11, %v921_v58 }
 0x118   :  { %1371 = vmatprep.subr.mxu1 %v925_v59 }
 0x11b   :  { %1372 = vmatpush3.msra.mxu1 %v925_v59 }
 0x11e   :  { %1374 = vmatmul.mubr.msk.f32.vlgmr.msra.gmra.mrb[2].mxu1 %vm1016_vm11, %v922_v60 }
 0x1f1   :  { %v1375_v2 = vpop.f32.mrb[2].mxu1 }
 0x1f2   :  { %v1106_v3 = vadd.f32 %v1375_v2, %v1255_v1  ;;  %v1089_v4 = vpop.f32.mrb[3].mxu1 }
 0x1f3   :  { %v1105_v5 = vadd.f32 %v1255_v1, %v1089_v4 }
 0x1f4   :  { %v1108_v7 = vmax.f32 %v1106_v3, 0.0 }
 0x1f5   :  { %v1107_v6 = vmax.f32 %v1105_v5, 0.0 }
 0x1f7   :  { %1384 = vmatprep.mubr.msk.f32.mxu0 %vm263_vm9, %v1107_v6 }
 0x1f8   :  { %1385 = vmatmul.mubr.msk.f32.vlgmr.msra.gmra.mrb[4].mxu0 %vm263_vm9, %v1108_v7 }
 0x2cb   :  { %v1386_v10 = vpop.f32.mrb[4].mxu0 }
 0x2cc   :  { %v1198_v11 = vadd.f32 %v1386_v10, %v1256_v9  ;;  %v1192_v12 = vpop.f32.mrb[5].mxu0 }
 0x2cd   :  { %v1193_v14 = vadd.f32 %v1256_v9, %v1192_v12 }
 0x2ce   :  { %v1202_v16 = vmax.f32 %v1198_v11, 0.0 }
 0x2cf   :  { %v1201_v0 = vmax.f32 %v1193_v14, 0.0 }
 0x2d0   :  { %v1211_v22 = vmul.f32 %v1259_v15, %v1202_v16 }
 0x2d1   :  { %v1210_v17 = vmul.f32 %v1259_v15, %v1201_v0 }
 0x2d2   :  { %v1215_v19 = vsel %vm263_vm9, %v1211_v22, 0.0 }
 0x2d3   :  { %v1212_v18 = vsel %vm263_vm9, %v1210_v17, 0.0 }
 0x2d4   :  { %1213 = vadd.xlane.f32.xlu0 %v1212_v18 }
 0x2d8   :  { %1216 = vadd.xlane.f32.xlu0 %v1215_v19 }
 0x361   :  { %v1214_v21 = vpop.xlane.xlu0 %1213 }
 0x362   :  { %v1225_v23 = vadd.f32 %v1260_v20, %v1214_v21 }
 0x364   :  { %1228 = vst.msk [vmem:[%s2020_s13] sm:$0xff] %vm1227_vm12, %v1225_v23 }
 0x365   :  { %v1217_v24 = vpop.xlane.xlu0 %1216 }
 0x366   :  { %v1226_v25 = vadd.f32 %v1260_v20, %v1217_v24 }
 0x368   :  { %1229 = vst.msk [vmem:[%s2020_s13 + $0x8] sm:$0xff] %vm1227_vm12, %v1226_v25 }

</bundles_post_ra>
